<compile_context>
chip_gen: v7x
topology: tpu7x:2x2x1
jax: 0.10.0
libtpu: 0.0.40
codegen_flags: <defaults>
</compile_context>

<pallas_src>
import jax
import jax.numpy as jnp
from jax.experimental import pallas as pl
from jax.experimental.pallas import tpu as pltpu


def _fused_kernel(x_all_ref, x_blk_ref, t_ref, s_ref, o_ref):
    # ---- stage 1 (MXU): matrices = x @ T_flat, kept on-chip (no HBM round-trip)
    t = t_ref[...]                                                   # [in_f, okd]
    m_all = jnp.dot(x_all_ref[...], t,
                    preferred_element_type=jnp.float32)              # [N,  okd]
    m_blk = jnp.dot(x_blk_ref[...], t,
                    preferred_element_type=jnp.float32)              # [TQ, okd]

    tq, okd = m_blk.shape
    n = m_all.shape[0]
    out_f = s_ref.shape[1]

    # ---- stage 2 (VPU + MXU): pairwise L1 over kernel_dim, lane-dense layout.
    # |m_i - m_j| on the flat [TQ, N, out*kd] layout (full-lane VPU work) ...
    diff = jnp.abs(m_blk[:, None, :] - m_all[None, :, :])            # [TQ, N, okd]
    # ... then the kd-sum as a matmul against a static 0/1 block-selection
    # matrix so the reduction runs on the MXU, not the VALU.
    norm = jnp.dot(diff.reshape(tq * n, okd), s_ref[...],
                   preferred_element_type=jnp.float32)               # [TQ*N, out]
    # exp on the post-reduction tensor (EUP work stays O(N^2 * out)).
    expnorm = jnp.exp(-norm).reshape(tq, n, out_f)                   # [TQ, N, out]
    # subtract 1 to remove the self-similarity term (exp(0) == 1)
    o_ref[...] = jnp.sum(expnorm, axis=1) - 1.0                      # [TQ, out]


def minibatch_discrimination(x, T, *, block_rows=None):
    """x: [N, in_features] f32; T: [in_features, out_features, kernel_dim] f32.

    Returns o_b: [N, out_features] (same as the PyTorch module's forward).
    """
    N, in_features = x.shape
    in_f2, out_features, kernel_dim = T.shape
    assert in_features == in_f2
    okd = out_features * kernel_dim

    # Flatten T exactly like T.view(in_features, -1) (row-major): col = o*kd + k.
    t_flat = T.reshape(in_features, okd)

    # Static 0/1 block-selection matrix: S[o*kd + k, o] = 1 -> norm = abs_diff @ S.
    sel = jnp.repeat(jnp.eye(out_features, dtype=jnp.float32),
                     kernel_dim, axis=0)                             # [okd, out]

    if block_rows is None:
        block_rows = N if N <= 128 else 128
    assert N % block_rows == 0, "batch size must be divisible by block_rows"
    grid = (N // block_rows,)

    # TODO(synk): for large N, add a j-reduction grid axis (tile the all-rows
    # operand) so the resident working set stays bounded on v7x's 64 MiB VMEM.
    return pl.pallas_call(
        _fused_kernel,
        out_shape=jax.ShapeDtypeStruct((N, out_features), jnp.float32),
        grid=grid,
        in_specs=[
            pl.BlockSpec((N, in_features), lambda i: (0, 0)),           # all rows
            pl.BlockSpec((block_rows, in_features), lambda i: (i, 0)),  # this row-block
            pl.BlockSpec((in_features, okd), lambda i: (0, 0)),         # T (flat)
            pl.BlockSpec((okd, out_features), lambda i: (0, 0)),        # selection S
        ],
        out_specs=pl.BlockSpec((block_rows, out_features), lambda i: (i, 0)),
        compiler_params=pltpu.CompilerParams(
            dimension_semantics=("parallel",),   # disjoint output row-blocks
        ),
    )(x, x, t_flat, sel)


def _reference(x, T):
    N, in_features = x.shape
    _, out_features, kernel_dim = T.shape
    m = (x @ T.reshape(in_features, -1)).reshape(N, out_features, kernel_dim)
    Mb = m[None, :, :, :]              # [1, N, out, kd]
    Mt = m[:, None, :, :]              # [N, 1, out, kd]
    norm = jnp.abs(Mb - Mt).sum(-1)    # [N, N, out]
    expnorm = jnp.exp(-norm)
    return expnorm.sum(0) - 1.0        # [N, out]


if __name__ == "__main__":
    # Deterministic parameter / input construction (no checkpoint loading).
    N = 8                # batch size
    in_features = 32
    out_features = 16
    kernel_dim = 8       # out_features * kernel_dim == 128 (lane-dense)

    key = jax.random.PRNGKey(0)
    kx, kt = jax.random.split(key)
    x = jax.random.normal(kx, (N, in_features), dtype=jnp.float32)
    # nn.init.normal_(T, 0, 1)
    T = jax.random.normal(kt, (in_features, out_features, kernel_dim),
                          dtype=jnp.float32)

    out = minibatch_discrimination(x, T)
    out = jax.block_until_ready(out)

    ref = _reference(x, T)
    assert out.shape == (N, out_features)
    assert jnp.allclose(out, ref, atol=1e-4, rtol=1e-4), (
        f"max abs err {jnp.max(jnp.abs(out - ref))}"
    )
    print("KERNEL_OK")
</pallas_src>

<mosaic_0001>
module attributes {stable_mosaic.version = 11 : i64} {
  func.func @_fused_kernel(%arg0: i32, %arg1: memref<8x32xf32, #tpu.memory_space<vmem>>, %arg2: memref<8x32xf32, #tpu.memory_space<vmem>>, %arg3: memref<32x128xf32, #tpu.memory_space<vmem>>, %arg4: memref<128x16xf32, #tpu.memory_space<vmem>>, %arg5: memref<8x16xf32, #tpu.memory_space<vmem>>) attributes {dimension_semantics = [#tpu.dimension_semantics<parallel>], iteration_bounds = array<i64: 1>, scalar_prefetch = 0 : i64, scratch_operands = 0 : i64, tpu.core_type = #tpu.core_type<tc>, window_params = [{pipeline_mode = #tpu.pipeline_mode<synchronous>, transform_indices = @transform_0, window_bounds = array<i64: 8, 32>}, {transform_indices = @transform_1, window_bounds = array<i64: 8, 32>}, {pipeline_mode = #tpu.pipeline_mode<synchronous>, transform_indices = @transform_2, window_bounds = array<i64: 32, 128>}, {pipeline_mode = #tpu.pipeline_mode<synchronous>, transform_indices = @transform_3, window_bounds = array<i64: 128, 16>}, {transform_indices = @transform_4, window_bounds = array<i64: 8, 16>}]} {
    %c0 = arith.constant 0 : index
    %c0_0 = arith.constant 0 : index
    %0 = vector.load %arg3[%c0, %c0_0] : memref<32x128xf32, #tpu.memory_space<vmem>>, vector<32x128xf32>
    %c0_1 = arith.constant 0 : index
    %c0_2 = arith.constant 0 : index
    %1 = vector.load %arg1[%c0_1, %c0_2] : memref<8x32xf32, #tpu.memory_space<vmem>>, vector<8x32xf32>
    %cst = arith.constant dense<0.000000e+00> : vector<8x128xf32>
    %2 = tpu.matmul %1, %0, %cst {dimension_numbers = #tpu.dot_dimension_numbers<[1], [0], [0], [1], [0, 0, 1, 1], [], []>} : vector<8x32xf32>, vector<32x128xf32>, vector<8x128xf32> -> vector<8x128xf32>
    %c0_3 = arith.constant 0 : index
    %c0_4 = arith.constant 0 : index
    %3 = vector.load %arg2[%c0_3, %c0_4] : memref<8x32xf32, #tpu.memory_space<vmem>>, vector<8x32xf32>
    %cst_5 = arith.constant dense<0.000000e+00> : vector<8x128xf32>
    %4 = tpu.matmul %3, %0, %cst_5 {dimension_numbers = #tpu.dot_dimension_numbers<[1], [0], [0], [1], [0, 0, 1, 1], [], []>} : vector<8x32xf32>, vector<32x128xf32>, vector<8x128xf32> -> vector<8x128xf32>
    %5 = vector.shape_cast %4 : vector<8x128xf32> to vector<8x1x128xf32>
    %6 = vector.shape_cast %2 : vector<8x128xf32> to vector<1x8x128xf32>
    %7 = vector.broadcast %5 : vector<8x1x128xf32> to vector<8x8x128xf32>
    %8 = vector.broadcast %6 : vector<1x8x128xf32> to vector<8x8x128xf32>
    %9 = arith.subf %7, %8 : vector<8x8x128xf32>
    %10 = math.absf %9 : vector<8x8x128xf32>
    %11 = vector.shape_cast %10 : vector<8x8x128xf32> to vector<64x128xf32>
    %c0_6 = arith.constant 0 : index
    %c0_7 = arith.constant 0 : index
    %12 = vector.load %arg4[%c0_6, %c0_7] : memref<128x16xf32, #tpu.memory_space<vmem>>, vector<128x16xf32>
    %cst_8 = arith.constant dense<0.000000e+00> : vector<64x16xf32>
    %13 = tpu.matmul %11, %12, %cst_8 {dimension_numbers = #tpu.dot_dimension_numbers<[1], [0], [0], [1], [0, 0, 1, 1], [], []>} : vector<64x128xf32>, vector<128x16xf32>, vector<64x16xf32> -> vector<64x16xf32>
    %cst_9 = arith.constant 0.000000e+00 : f32
    %14 = vector.broadcast %cst_9 : f32 to vector<64x16xf32>
    %15 = arith.subf %14, %13 : vector<64x16xf32>
    %16 = math.exp %15 : vector<64x16xf32>
    %17 = vector.shape_cast %16 : vector<64x16xf32> to vector<8x8x16xf32>
    %cst_10 = arith.constant dense<0.000000e+00> : vector<8x16xf32>
    %18 = vector.multi_reduction <add>, %17, %cst_10 [1] : vector<8x8x16xf32> to vector<8x16xf32>
    %cst_11 = arith.constant 1.000000e+00 : f32
    %19 = vector.broadcast %cst_11 : f32 to vector<8x16xf32>
    %20 = arith.subf %18, %19 : vector<8x16xf32>
    %c0_12 = arith.constant 0 : index
    %c0_13 = arith.constant 0 : index
    %21 = vector.load %arg5[%c0_12, %c0_13] : memref<8x16xf32, #tpu.memory_space<vmem>>, vector<8x16xf32>
    tpu.vector_store %arg5[%c0_12, %c0_13], %20 {strides = array<i32>} : memref<8x16xf32, #tpu.memory_space<vmem>>, vector<8x16xf32>,
    return
  }
  func.func @transform_0(%arg0: i32) -> (i32, i32) {
    %c0_i32 = arith.constant 0 : i32
    %c0_i32_0 = arith.constant 0 : i32
    %c0_i32_1 = arith.constant 0 : i32
    return %c0_i32, %c0_i32_0 : i32, i32
  }
  func.func @transform_1(%arg0: i32) -> (i32, i32) {
    %c0_i32 = arith.constant 0 : i32
    %c0_i32_0 = arith.constant 0 : i32
    return %arg0, %c0_i32 : i32, i32
  }
  func.func @transform_2(%arg0: i32) -> (i32, i32) {
    %c0_i32 = arith.constant 0 : i32
    %c0_i32_0 = arith.constant 0 : i32
    %c0_i32_1 = arith.constant 0 : i32
    return %c0_i32, %c0_i32_0 : i32, i32
  }
  func.func @transform_3(%arg0: i32) -> (i32, i32) {
    %c0_i32 = arith.constant 0 : i32
    %c0_i32_0 = arith.constant 0 : i32
    %c0_i32_1 = arith.constant 0 : i32
    return %c0_i32, %c0_i32_0 : i32, i32
  }
  func.func @transform_4(%arg0: i32) -> (i32, i32) {
    %c0_i32 = arith.constant 0 : i32
    %c0_i32_0 = arith.constant 0 : i32
    return %arg0, %c0_i32 : i32, i32
  }
}

</mosaic_0001>

<bundles_post_ra>
// kernel: tpu_custom_call.1
= control target key start
LH: loop header
LB: loop body
LE: loop exit
PB: predicated region body
PF: predicated region fallthrough
CT: control target
= control target key end

     0   :  { %v724_v3 = vmov 0.0|0.0   ;;  %vm725_vm0 = vmmov 0   ;;  %v726_v6 = vmov 0.0   ;;  %s844_s0 = inlined_call_operand.vmem [shape: f32[8,32], index: 0, kind: input, shape index: {}]   ;;  %s845_s1 = inlined_call_operand.vmem [shape: f32[8,32], index: 1, kind: input, shape index: {}]   ;;  %s846_s2 = inlined_call_operand.vmem [shape: f32[32,128], index: 2, kind: input, shape index: {}]   ;;  %s847_s3 = inlined_call_operand.vmem [shape: f32[128,16], index: 3, kind: input, shape index: {}]   ;;  %s848_s4 = inlined_call_operand.hbm [shape: f32[8,16], index: 4, kind: output, shape index: {}]  }
   0x1   :  { %v18_v0 = vld [vmem:[%s846_s2] sm:$0xff]  ;;  %v19_v1 = vld [vmem:[%s846_s2 + $0x8] sm:$0xff]  ;;  %v20_v2 = vld [vmem:[%s846_s2 + $0x10] sm:$0xff]  ;;  %635 = vmatprep.subr.bf16.mxu1 %v724_v3  ;;  %577 = vmatprep.mubr.msk.f32.mxu1 %vm725_vm0, %v726_v6 }
   0x2   :  { %v636_v4 = vpack.c.bf16 %v19_v1, %v18_v0  ;;  %v21_v5 = vld [vmem:[%s846_s2 + $0x18] sm:$0xff]  ;;  %v277_v7 = vld [vmem:[%s847_s3] sm:$0xff]  ;;  %v278_v8 = vld [vmem:[%s847_s3 + $0x8] sm:$0xff] }
   0x3   :  { %v279_v9 = vld [vmem:[%s847_s3 + $0x10] sm:$0xff]  ;;  %v639_v10 = vpack.c.bf16 %v21_v5, %v20_v2  ;;  %v647_v11 = vpack.c.bf16 %v278_v8, %v277_v7  ;;  %v280_v12 = vld [vmem:[%s847_s3 + $0x18] sm:$0xff] }
   0x4   :  { %637 = vmatpush3.bf16.msra.mxu1 %v636_v4  ;;  %v651_v13 = vpack.c.bf16 %v280_v12, %v279_v9 }
   0x5   :  { %638 = vmatprep.subr.bf16.mxu1 %v724_v3 }
   0x6   :  { %9 = vsyncpa [#allocation3], 0  ;;  %648 = vmatprep.subr.bf16.mxu0 %v647_v11  ;;  %v281_v14 = vld [vmem:[%s847_s3 + $0x20] sm:$0xff]  ;;  %v282_v15 = vld [vmem:[%s847_s3 + $0x28] sm:$0xff]  ;;  %vm23_vm1 = vcmask 261120   ;;  %v176_v36 = vlaneseq  ;;  %vm422_vm2 = vcmask 130048  }
   0x7   :  { %650 = vmatpush3.bf16.msra.mxu0 %v647_v11  ;;  %v22_v16 = vld [vmem:[%s844_s0] sm:$0xff]  ;;  %v655_v17 = vpack.c.bf16 %v282_v15, %v281_v14  ;;  %v283_v19 = vld [vmem:[%s847_s3 + $0x30] sm:$0xff]  ;;  %v284_v20 = vld [vmem:[%s847_s3 + $0x38] sm:$0xff]  ;;  %v727_v34 = vmov 1966171168   ;;  %vm495_vm3 = vcmask 1041409  }
   0x8   :  { %640 = vmatpush3.bf16.msra.mxu1 %v639_v10  ;;  %652 = vmatprep.subr.bf16.mxu0 %v651_v13  ;;  %v97_v18 = vld [vmem:[%s845_s1] sm:$0xff]  ;;  %v659_v21 = vpack.c.bf16 %v284_v20, %v283_v19  ;;  %v286_v23 = vld [vmem:[%s847_s3 + $0x48] sm:$0xff]  ;;  %v287_v25 = vld [vmem:[%s847_s3 + $0x50] sm:$0xff]  ;;  %v174_v35 = vunpack.c.l.s4 %v727_v34  ;;  %v177_v40 = vshrl.u32 %v176_v36, 7  ;;  %vm497_vm4 = vcmask 1042434  }
   0x9   :  { %641 = vmatprep.subr.bf16.mxu1 %v724_v3  ;;  %v285_v22 = vld [vmem:[%s847_s3 + $0x40] sm:$0xff]  ;;  %v288_v26 = vld [vmem:[%s847_s3 + $0x58] sm:$0xff]  ;;  %v290_v29 = vld [vmem:[%s847_s3 + $0x68] sm:$0xff]  ;;  %vm499_vm5 = vcmask 1043459   ;;  %vm501_vm6 = vcmask 1044484   ;;  %vm503_vm7 = vcmask 1045509  }
   0xa   :  { %v663_v24 = vpack.c.bf16 %v286_v23, %v285_v22  ;;  %v667_v27 = vpack.c.bf16 %v288_v26, %v287_v25  ;;  %v289_v28 = vld [vmem:[%s847_s3 + $0x60] sm:$0xff]  ;;  %v291_v31 = vld [vmem:[%s847_s3 + $0x70] sm:$0xff]  ;;  %v292_v32 = vld [vmem:[%s847_s3 + $0x78] sm:$0xff]  ;;  %v175_v39 = vunpack.c.0.s8 %v174_v35  ;;  %v223_v46 = vsub.s32 0, %v177_v40  ;;  %s728_s3 = smov [#allocation2]  }
   0xb   :  { %578 = vmatmul.mubr.msk.f32.vlgmr.msra.gmra.mrb[0].mxu1 %vm23_vm1, %v22_v16  ;;  %654 = vmatpush3.bf16.msra.mxu0 %v651_v13  ;;  %v671_v30 = vpack.c.bf16 %v290_v29, %v289_v28  ;;  %v675_v33 = vpack.c.bf16 %v292_v32, %v291_v31  ;;  %vm505_vm8 = vcmask 1046534   ;;  %s517_s29 = sshll.u32 %s728_s3, 4  ;;  %vm507_vm9 = vcmask 1047559   ;;  %s518_s29 = int_to_ptr.vmem [resolvable:$true] %s517_s29 }
   0xc   :  { %643 = vmatpush3.bf16.msra.mxu1 %v636_v4  ;;  %588 = vmatprep.mubr.msk.f32.mxu1 %vm725_vm0, %v726_v6  ;;  %v178_v41 = vsub.s32 %v175_v39, %v177_v40  ;;  %s700_s30 = scalar_lea.vmem %s518_s29, 128  ;;  %p705_p1 = scmp.lt.s32.totalorder %s518_s29, %s518_s29 }
   0xd   :  { %644 = vmatprep.subr.bf16.mxu1 %v724_v3  ;;  %656 = vmatprep.subr.bf16.mxu0 %v655_v17  ;;  %p701_p0 = scmp.ne.s32.totalorder %s518_s29, %s700_s30  ;;  %p706_p2 = scmp.lt.s32.totalorder %s700_s30, %s700_s30 }
   0xf   :  { %658 = vmatpush3.bf16.msra.mxu0 %v655_v17  ;;  %p707_p3 = por %p706_p2, %p705_p1 }
  0x10   :  { %646 = vmatpush3.bf16.msra.mxu1 %v639_v10  ;;  %660 = vmatprep.subr.bf16.mxu0 %v659_v21 }
  0x11   :  { %p708_p4 = pnand %p707_p3, %p701_p0 }
  0x13   :  { %589 = vmatmul.mubr.msk.f32.vlgmr.msra.gmra.mrb[2].mxu1 %vm23_vm1, %v97_v18  ;;  %662 = vmatpush3.bf16.msra.mxu0 %v659_v21 }
  0x14   :  { %664 = vmatprep.subr.bf16.mxu0 %v663_v24 }
  0x17   :  { %666 = vmatpush3.bf16.msra.mxu0 %v663_v24 }
  0x18   :  { %668 = vmatprep.subr.bf16.mxu0 %v667_v27 }
  0x1b   :  { %670 = vmatpush3.bf16.msra.mxu0 %v667_v27 }
  0x1c   :  { %672 = vmatprep.subr.bf16.mxu0 %v671_v30 }
  0x1f   :  { %674 = vmatpush3.bf16.msra.mxu0 %v671_v30 }
  0x20   :  { %676 = vmatprep.subr.bf16.mxu0 %v675_v33 }
  0x23   :  { %678 = vmatpush3.bf16.msra.mxu0 %v675_v33 }
  0xde   :  { %v93_v37 = vpop.f32.mrb[0].mxu1 }
  0xdf   :  { %v579_v38 = vpop.f32.mrb[1].mxu1 }
  0xe6   :  { %v167_v42 = vpop.f32.mrb[2].mxu1 }
  0xe7   :  { %v172_v43 = vcombine.high %v167_v42, %v167_v42  ;;  %v179_v44 = vrot.slane %v167_v42, %v178_v41  ;;  %v590_v45 = vpop.f32.mrb[3].mxu1 }
  0xe9   :  { %v186_v47 = vrot.slane %v172_v43, %v178_v41  ;;  %v187_v48 = vcombine.high %v179_v44, %v179_v44  ;;  %v195_v49 = vrot.slane %v179_v44, %v178_v41 }
  0xeb   :  { %v188_v50 = vcombine.high %v186_v47, %v186_v47  ;;  %v202_v51 = vrot.slane %v186_v47, %v178_v41  ;;  %v209_v52 = vrot.slane %v187_v48, %v178_v41  ;;  %v217_v53 = vcombine.high %v195_v49, %v195_v49 }
  0xec   :  { %v224_v54 = vrot.slane %v195_v49, %v223_v46 }
  0xed   :  { %v216_v55 = vrot.slane %v188_v50, %v178_v41  ;;  %v218_v56 = vcombine.high %v202_v51, %v202_v51  ;;  %v219_v57 = vcombine.high %v209_v52, %v209_v52  ;;  %v228_v58 = vrot.slane %v209_v52, %v223_v46 }
  0xee   :  { %v261_v59 = vsub.f32 %v224_v54, %v93_v37  ;;  %v232_v60 = vrot.slane %v217_v53, %v223_v46  ;;  %v240_v61 = vrot.slane %v202_v51, %v223_v46 }
  0xef   :  { %v262_v62 = vsub.f32 %v228_v58, %v93_v37  ;;  %v236_v63 = vrot.slane %v219_v57, %v223_v46  ;;  %v244_v0 = vrot.slane %v216_v55, %v223_v46  ;;  %v248_v1 = vrot.slane %v218_v56, %v223_v46 }
  0xf0   :  { %v269_v2 = vand.u32 2147483647, %v261_v59  ;;  %v263_v3 = vsub.f32 %v232_v60, %v93_v37  ;;  %v265_v4 = vsub.f32 %v240_v61, %v93_v37  ;;  %v220_v5 = vcombine.high %v216_v55, %v216_v55 }
  0xf1   :  { %v270_v6 = vand.u32 2147483647, %v262_v62  ;;  %v264_v7 = vsub.f32 %v236_v63, %v93_v37  ;;  %v266_v8 = vsub.f32 %v244_v0, %v93_v37  ;;  %v267_v9 = vsub.f32 %v248_v1, %v93_v37 }
  0xf2   :  { %623 = vmatprep.mubr.f32.mxu0 %v269_v2  ;;  %v271_v10 = vand.u32 2147483647, %v263_v3  ;;  %v252_v11 = vrot.slane %v220_v5, %v223_v46  ;;  %v273_v14 = vand.u32 2147483647, %v265_v4 }
  0xf3   :  { %624 = vmatmul.mubr.f32.vlgmr.msra.gmra.mrb[0].mxu0 %v270_v6  ;;  %v272_v13 = vand.u32 2147483647, %v264_v7  ;;  %v274_v15 = vand.u32 2147483647, %v266_v8  ;;  %v275_v16 = vand.u32 2147483647, %v267_v9 }
  0xf4   :  { %626 = vmatprep.mubr.f32.mxu0 %v271_v10  ;;  %v268_v12 = vsub.f32 %v252_v11, %v93_v37 }
  0xf6   :  { %v276_v17 = vand.u32 2147483647, %v268_v12 }
  0xf7   :  { %627 = vmatmul.mubr.f32.gmra.mrb[2].mxu0 %v272_v13 }
  0xf8   :  { %629 = vmatprep.mubr.f32.mxu0 %v273_v14 }
  0xfb   :  { %630 = vmatmul.mubr.f32.gmra.mrb[4].mxu0 %v274_v15 }
  0xfc   :  { %632 = vmatprep.mubr.f32.mxu0 %v275_v16 }
  0xff   :  { %633 = vmatmul.mubr.f32.gmra.mrb[6].mxu0 %v276_v17 }
 0x1c6   :  { %v625_v18 = vpop.f32.mrb[0].mxu0 }
 0x1c7   :  { %v399_v19 = vsub.f32 0.0, %v625_v18  ;;  %v359_v20 = vpop.f32.mrb[1].mxu0 }
 0x1c8   :  { %v398_v21 = vsub.f32 0.0, %v359_v20 }
 0x1c9   :  { %v408_v22 = vmul.f32 1.442695, %v399_v19 }
 0x1ca   :  { %v406_v23 = vmul.f32 1.442695, %v398_v21  ;;  %v628_v24 = vpop.f32.mrb[2].mxu0 }
 0x1cb   :  { %684 = vpow2.f32 %v408_v22  ;;  %v401_v25 = vsub.f32 0.0, %v628_v24  ;;  %v369_v26 = vpop.f32.mrb[3].mxu0 }
 0x1cc   :  { %686 = vpow2.f32 %v406_v23  ;;  %v400_v27 = vsub.f32 0.0, %v369_v26 }
 0x1cd   :  { %v412_v28 = vmul.f32 1.442695, %v401_v25 }
 0x1ce   :  { %v410_v29 = vmul.f32 1.442695, %v400_v27  ;;  %v631_v30 = vpop.f32.mrb[4].mxu0 }
 0x1cf   :  { %688 = vpow2.f32 %v412_v28  ;;  %v403_v31 = vsub.f32 0.0, %v631_v30  ;;  %v379_v32 = vpop.f32.mrb[5].mxu0 }
 0x1d0   :  { %690 = vpow2.f32 %v410_v29  ;;  %v402_v33 = vsub.f32 0.0, %v379_v32 }
 0x1d1   :  { %v416_v34 = vmul.f32 1.442695, %v403_v31 }
 0x1d2   :  { %v414_v35 = vmul.f32 1.442695, %v402_v33  ;;  %v634_v36 = vpop.f32.mrb[6].mxu0 }
 0x1d3   :  { %692 = vpow2.f32 %v416_v34  ;;  %v405_v37 = vsub.f32 0.0, %v634_v36  ;;  %v389_v38 = vpop.f32.mrb[7].mxu0 }
 0x1d4   :  { %694 = vpow2.f32 %v414_v35  ;;  %v404_v39 = vsub.f32 0.0, %v389_v38 }
 0x1d5   :  { %v685_v40 = vpop.eup %684  ;;  %v420_v41 = vmul.f32 1.442695, %v405_v37 }
 0x1d6   :  { %v687_v42 = vpop.eup %686  ;;  %v430_v43 = vsel %vm422_vm2, %v685_v40, 0.0  ;;  %v418_v44 = vmul.f32 1.442695, %v404_v39 }
 0x1d7   :  { %v431_v45 = vrot.slane %v430_v43, 4  ;;  %v423_v46 = vsel %vm422_vm2, %v687_v42, 0.0  ;;  %696 = vpow2.f32 %v420_v41 }
 0x1d8   :  { %v424_v47 = vrot.slane %v423_v46, 4  ;;  %698 = vpow2.f32 %v418_v44 }
 0x1d9   :  { %v689_v48 = vpop.eup %688  ;;  %v432_v49 = vadd.f32 %v431_v45, %v430_v43 }
 0x1da   :  { %v691_v50 = vpop.eup %690  ;;  %v425_v51 = vadd.f32 %v424_v47, %v423_v46  ;;  %v444_v52 = vsel %vm422_vm2, %v689_v48, 0.0 }
 0x1db   :  { %v433_v53 = vrot.slane %v432_v49, 2  ;;  %v445_v54 = vrot.slane %v444_v52, 4  ;;  %v437_v55 = vsel %vm422_vm2, %v691_v50, 0.0 }
 0x1dc   :  { %v426_v56 = vrot.slane %v425_v51, 2  ;;  %v438_v57 = vrot.slane %v437_v55, 4 }
 0x1dd   :  { %v693_v58 = vpop.eup %692  ;;  %v434_v59 = vadd.f32 %v433_v53, %v432_v49  ;;  %v446_v60 = vadd.f32 %v445_v54, %v444_v52 }
 0x1de   :  { %v695_v61 = vpop.eup %694  ;;  %v427_v62 = vadd.f32 %v426_v56, %v425_v51  ;;  %v439_v63 = vadd.f32 %v438_v57, %v437_v55  ;;  %v458_v0 = vsel %vm422_vm2, %v693_v58, 0.0 }
 0x1df   :  { %v435_v1 = vrot.slane %v434_v59, 1  ;;  %v447_v2 = vrot.slane %v446_v60, 2  ;;  %v459_v3 = vrot.slane %v458_v0, 4  ;;  %v451_v4 = vsel %vm422_vm2, %v695_v61, 0.0 }
 0x1e0   :  { %v428_v5 = vrot.slane %v427_v62, 1  ;;  %v440_v6 = vrot.slane %v439_v63, 2  ;;  %v452_v7 = vrot.slane %v451_v4, 4 }
 0x1e1   :  { %v697_v8 = vpop.eup %696  ;;  %v436_v9 = vadd.f32 %v435_v1, %v434_v59  ;;  %v448_v10 = vadd.f32 %v447_v2, %v446_v60  ;;  %v460_v11 = vadd.f32 %v459_v3, %v458_v0 }
 0x1e2   :  { %v699_v12 = vpop.eup %698  ;;  %v429_v13 = vadd.f32 %v428_v5, %v427_v62  ;;  %v441_v14 = vadd.f32 %v440_v6, %v439_v63  ;;  %v453_v15 = vadd.f32 %v452_v7, %v451_v4  ;;  %v472_v16 = vsel %vm422_vm2, %v697_v8, 0.0 }
 0x1e3   :  { %v528_v17 = vadd.f32 -1.0, %v436_v9  ;;  %v449_v18 = vrot.slane %v448_v10, 1  ;;  %v461_v19 = vrot.slane %v460_v11, 2  ;;  %v473_v20 = vrot.slane %v472_v16, 4 }
 0x1e4   :  { %v527_v21 = vadd.f32 -1.0, %v429_v13  ;;  %v442_v22 = vrot.slane %v441_v14, 1  ;;  %v454_v23 = vrot.slane %v453_v15, 2  ;;  %v465_v24 = vsel %vm422_vm2, %v699_v12, 0.0 }
 0x1e5   :  { %v466_v25 = vrot.slane %v465_v24, 4  ;;  %v450_v26 = vadd.f32 %v449_v18, %v448_v10  ;;  %v462_v27 = vadd.f32 %v461_v19, %v460_v11  ;;  %v474_v28 = vadd.f32 %v473_v20, %v472_v16 }
 0x1e6   :  { %v443_v29 = vadd.f32 %v442_v22, %v441_v14  ;;  %v455_v30 = vadd.f32 %v454_v23, %v453_v15  ;;  %v496_v31 = vsel %vm495_vm3, %v528_v17, %v527_v21 }
 0x1e7   :  { %v467_v32 = vadd.f32 %v466_v25, %v465_v24  ;;  %v463_v33 = vrot.slane %v462_v27, 1  ;;  %v475_v34 = vrot.slane %v474_v28, 2  ;;  %v530_v40 = vadd.f32 -1.0, %v450_v26 }
 0x1e8   :  { %v529_v35 = vadd.f32 -1.0, %v443_v29  ;;  %v456_v36 = vrot.slane %v455_v30, 1 }
 0x1e9   :  { %v464_v37 = vadd.f32 %v463_v33, %v462_v27  ;;  %v468_v38 = vrot.slane %v467_v32, 2  ;;  %v476_v39 = vadd.f32 %v475_v34, %v474_v28 }
 0x1ea   :  { %v457_v41 = vadd.f32 %v456_v36, %v455_v30  ;;  %v498_v42 = vsel %vm497_vm4, %v529_v35, %v496_v31 }
 0x1eb   :  { %v469_v43 = vadd.f32 %v468_v38, %v467_v32  ;;  %v477_v44 = vrot.slane %v476_v39, 1  ;;  %v500_v45 = vsel %vm499_vm5, %v530_v40, %v498_v42  ;;  %v532_v48 = vadd.f32 -1.0, %v464_v37 }
 0x1ec   :  { %v531_v46 = vadd.f32 -1.0, %v457_v41 }
 0x1ed   :  { %v470_v47 = vrot.slane %v469_v43, 1  ;;  %v478_v49 = vadd.f32 %v477_v44, %v476_v39 }
 0x1ee   :  { %v502_v50 = vsel %vm501_vm6, %v531_v46, %v500_v45 }
 0x1ef   :  { %v471_v51 = vadd.f32 %v470_v47, %v469_v43  ;;  %v504_v52 = vsel %vm503_vm7, %v532_v48, %v502_v50  ;;  %v534_v54 = vadd.f32 -1.0, %v478_v49 }
 0x1f1   :  { %v533_v53 = vadd.f32 -1.0, %v471_v51 }
 0x1f3   :  { %v506_v55 = vsel %vm505_vm8, %v533_v53, %v504_v52 }
 0x1f4   :  { %v508_v56 = vsel %vm507_vm9, %v534_v54, %v506_v55 }
 0x1f5   :  { %510 = vst.msk [vmem:[#allocation2] sm:$0xff] %vm422_vm2, %v508_v56 }
 0x1f6   :  { %711 = shalt.err (!%p708_p4)
}
 0x1f7   :  { %s712_s7 = scalar_lea.hbm %s848_s4, 128 }
 0x1f8   :  { %p713_p5 = scmp.ne.s32.totalorder %s848_s4, %s712_s7  ;;  %p716_p6 = scmp.lt.u32.totalorder %s712_s7, %s848_s4 }
 0x1fa   :  { %p718_p7 = pnand %p716_p6, %p713_p5 }
 0x1fc   :  { %721 = shalt.err (!%p718_p7)
}
 0x1fd   :  { %520 = dma.vmem_to_hbm [thread:$0]  %s518_s29, 128, %s848_s4, [#allocation3]  }
 0x1fe   :  { %722 = dma.done.wait [#allocation3], 128  }
 0x1ff   :  { %723 = vsyncadd [#allocation3], 4294967168 }
 0x200   :  { %524 = vsyncpa [#allocation3], 1 }

</bundles_post_ra>
